<compile_context>
chip_gen: v6e
topology: v6e:2x2x1
jax: 0.10.0
libtpu: 0.0.40
codegen_flags: <defaults>
</compile_context>

<pallas_src>
import functools

import jax
import jax.numpy as jnp
from jax import lax
from jax.experimental import pallas as pl
from jax.experimental.pallas import tpu as pltpu

_EPS = 1e-8  # torch.cosine_similarity default eps


def _triplet_rows_kernel(a_ref, p_ref, n_ref, o_ref, *, margin, total_rows,
                         tile_rows):
    """Per-row hinge loss for one batch tile; padded rows are zeroed."""
    i = pl.program_id(0)

    a = a_ref[...].astype(jnp.float32)
    p = p_ref[...].astype(jnp.float32)
    n = n_ref[...].astype(jnp.float32)

    # Row-wise dot products / squared norms over the hidden dim (lane reduce).
    dot_ap = jnp.sum(a * p, axis=1, keepdims=True)
    dot_an = jnp.sum(a * n, axis=1, keepdims=True)
    sq_a = jnp.sum(a * a, axis=1, keepdims=True)
    sq_p = jnp.sum(p * p, axis=1, keepdims=True)
    sq_n = jnp.sum(n * n, axis=1, keepdims=True)
    # TODO(synk): if a v7x bf16 profile shows the VALU slot saturating, push
    # these five reductions through the idle MXU (dot against a ones vector).

    # max(sqrt(s), eps) == sqrt(max(s, eps^2)), so 1/norm = rsqrt(max(s, eps^2)).
    eps2 = jnp.float32(_EPS * _EPS)
    inv_a = lax.rsqrt(jnp.maximum(sq_a, eps2))
    inv_p = lax.rsqrt(jnp.maximum(sq_p, eps2))
    inv_n = lax.rsqrt(jnp.maximum(sq_n, eps2))

    cos_pos = dot_ap * inv_a * inv_p
    cos_neg = dot_an * inv_a * inv_n

    # relu((1-cos_pos) - (1-cos_neg) + margin) == relu(cos_neg - cos_pos + margin)
    per_row = jnp.maximum((cos_neg - cos_pos) + jnp.float32(margin), 0.0)

    # Zero the padded rows of the ragged last tile (their garbage inputs may
    # have produced NaN/Inf).  The ragged write-back also clips them; this is
    # belt-and-braces so the wrapper-side sum can never be polluted.
    row_ids = lax.broadcasted_iota(jnp.int32, per_row.shape, 0)
    valid = (row_ids + i * tile_rows) < total_rows
    o_ref[...] = jnp.where(valid, per_row, 0.0)


def _vmem_capacity_bytes():
    """Physical VMEM of the current generation (conservative fallback)."""
    try:
        info = pltpu.get_tpu_info()
        cap = int(getattr(info, "vmem_capacity_bytes", 0) or 0)
        if cap > 0:
            return cap
    except Exception:
        pass
    return 64 << 20  # v7x per-TC value: the most conservative real chip


def triplet_loss(anchor, pos, neg, margin=0.5, *, tile_rows=None,
                 vmem_budget_bytes=None):
    """Pallas TPU implementation of TripletLoss.forward.

    anchor, pos, neg: (B, D) arrays (f32 or bf16).  Returns a float32 scalar.

    The kernel is HBM-bound on every TPU generation and upcasts internally,
    so prefer passing bf16 embeddings when available (~1.5-2x wall clock).
    """
    B, D = anchor.shape
    assert pos.shape == (B, D) and neg.shape == (B, D)

    itemsize = max(jnp.dtype(anchor.dtype).itemsize,
                   jnp.dtype(pos.dtype).itemsize,
                   jnp.dtype(neg.dtype).itemsize)
    # Sublane packing: 8 rows per sublane group for 32-bit, 16 for bf16, 32 for i8.
    sublane = 8 * max(1, 4 // itemsize)

    # Per-row VMEM cost: 3 inputs x 2 pipeline buffers in storage dtype, plus
    # the in-kernel f32 working set (upcasted copies + live products).
    f32_temps = 3 if itemsize >= 4 else 5
    bytes_per_row = (6 * itemsize + 4 * f32_temps) * D

    vmem_cap = _vmem_capacity_bytes()
    if vmem_budget_bytes is not None:
        work_budget = int(vmem_budget_bytes)
    elif vmem_cap >= (100 << 20):        # v5e / v6e: 128 MiB physical VMEM
        work_budget = 64 << 20
    else:                                # v7x: 64 MiB per TensorCore
        work_budget = 36 << 20

    if tile_rows is None:
        tb = max(sublane, work_budget // bytes_per_row)
        tile_rows = int((tb // sublane) * sublane)

    if tile_rows >= B:
        tile_rows = B                    # single full-extent block (any B allowed)
    else:
        tile_rows = max(sublane, (tile_rows // sublane) * sublane)

    num_blocks = pl.cdiv(B, tile_rows)

    # The limit always covers the working set implied by the chosen tile
    # (inputs double-buffered + f32 temporaries + output + headroom), capped
    # below the physical VMEM of this generation.
    need = tile_rows * bytes_per_row + 2 * tile_rows * 4 + (6 << 20)
    vmem_limit = int(max(16 << 20,
                         min(vmem_cap - (8 << 20), max(32 << 20, need))))

    kernel = functools.partial(
        _triplet_rows_kernel,
        margin=float(margin),
        total_rows=int(B),
        tile_rows=int(tile_rows),
    )

    per_row = pl.pallas_call(
        kernel,
        out_shape=jax.ShapeDtypeStruct((B, 1), jnp.float32),
        grid=(num_blocks,),
        in_specs=[
            pl.BlockSpec((tile_rows, D), lambda i: (i, 0)),   # anchor
            pl.BlockSpec((tile_rows, D), lambda i: (i, 0)),   # positive
            pl.BlockSpec((tile_rows, D), lambda i: (i, 0)),   # negative
        ],
        out_specs=pl.BlockSpec((tile_rows, 1), lambda i: (i, 0)),
        compiler_params=pltpu.CompilerParams(
            dimension_semantics=("parallel",),   # megacore-shardable on v7x
            vmem_limit_bytes=vmem_limit,
        ),
    )(anchor, pos, neg)

    # Final reduction + mean in plain XLA (tiny: B floats).
    return jnp.sum(per_row) * jnp.float32(1.0 / B)


def _reference(anchor, pos, neg, margin=0.5):
    anchor = anchor.astype(jnp.float32)
    pos = pos.astype(jnp.float32)
    neg = neg.astype(jnp.float32)

    def cos(x, y):
        xn = jnp.maximum(jnp.linalg.norm(x, axis=1), _EPS)
        yn = jnp.maximum(jnp.linalg.norm(y, axis=1), _EPS)
        return jnp.sum(x * y, axis=1) / (xn * yn)

    d_pos = 1.0 - cos(anchor, pos)
    d_neg = 1.0 - cos(anchor, neg)
    return jnp.mean(jnp.maximum(d_pos - d_neg + margin, 0.0))


if __name__ == "__main__":
    key = jax.random.PRNGKey(0)

    # --- Test 1: small f32 problem, default tile -> single full-extent block --
    k1, k2, k3, key = jax.random.split(key, 4)
    B, D = 8, 32
    a = jax.random.normal(k1, (B, D), dtype=jnp.float32)
    p = jax.random.normal(k2, (B, D), dtype=jnp.float32)
    n = jax.random.normal(k3, (B, D), dtype=jnp.float32)
    loss = triplet_loss(a, p, n, margin=0.5)
    jax.block_until_ready(loss)
    ref = _reference(a, p, n, margin=0.5)
    assert jnp.allclose(loss, ref, atol=1e-5, rtol=1e-5), (loss, ref)

    # --- Test 2: f32, forced small tile -> multi-block grid with ragged tail --
    k1, k2, k3, key = jax.random.split(key, 4)
    B, D = 20, 128
    a = jax.random.normal(k1, (B, D), dtype=jnp.float32)
    p = jax.random.normal(k2, (B, D), dtype=jnp.float32)
    n = jax.random.normal(k3, (B, D), dtype=jnp.float32)
    loss = triplet_loss(a, p, n, margin=0.3, tile_rows=8)
    jax.block_until_ready(loss)
    ref = _reference(a, p, n, margin=0.3)
    assert jnp.allclose(loss, ref, atol=1e-5, rtol=1e-5), (loss, ref)

    # --- Test 3: bf16 inputs (half HBM traffic), tiled + ragged tail ---------
    k1, k2, k3, key = jax.random.split(key, 4)
    B, D = 40, 128
    a = jax.random.normal(k1, (B, D), dtype=jnp.float32).astype(jnp.bfloat16)
    p = jax.random.normal(k2, (B, D), dtype=jnp.float32).astype(jnp.bfloat16)
    n = jax.random.normal(k3, (B, D), dtype=jnp.float32).astype(jnp.bfloat16)
    loss = triplet_loss(a, p, n, margin=0.5, tile_rows=16)
    jax.block_until_ready(loss)
    ref = _reference(a, p, n, margin=0.5)
    assert jnp.allclose(loss, ref, atol=1e-5, rtol=1e-5), (loss, ref)

    print("KERNEL_OK")
</pallas_src>

<mosaic_0001>
module attributes {stable_mosaic.version = 11 : i64} {
  func.func @_triplet_rows_kernel(%arg0: i32, %arg1: memref<8x32xf32, #tpu.memory_space<vmem>>, %arg2: memref<8x32xf32, #tpu.memory_space<vmem>>, %arg3: memref<8x32xf32, #tpu.memory_space<vmem>>, %arg4: memref<8x1xf32, #tpu.memory_space<vmem>>) attributes {dimension_semantics = [#tpu.dimension_semantics<parallel>], iteration_bounds = array<i64: 1>, scalar_prefetch = 0 : i64, scratch_operands = 0 : i64, tpu.core_type = #tpu.core_type<tc>, window_params = [{transform_indices = @transform_0, window_bounds = array<i64: 8, 32>}, {transform_indices = @transform_1, window_bounds = array<i64: 8, 32>}, {transform_indices = @transform_2, window_bounds = array<i64: 8, 32>}, {transform_indices = @transform_3, window_bounds = array<i64: 8, 1>}]} {
    %c0 = arith.constant 0 : index
    %c0_0 = arith.constant 0 : index
    %0 = vector.load %arg1[%c0, %c0_0] : memref<8x32xf32, #tpu.memory_space<vmem>>, vector<8x32xf32>
    %c0_1 = arith.constant 0 : index
    %c0_2 = arith.constant 0 : index
    %1 = vector.load %arg2[%c0_1, %c0_2] : memref<8x32xf32, #tpu.memory_space<vmem>>, vector<8x32xf32>
    %c0_3 = arith.constant 0 : index
    %c0_4 = arith.constant 0 : index
    %2 = vector.load %arg3[%c0_3, %c0_4] : memref<8x32xf32, #tpu.memory_space<vmem>>, vector<8x32xf32>
    %3 = arith.mulf %0, %1 : vector<8x32xf32>
    %cst = arith.constant dense<0.000000e+00> : vector<8xf32>
    %4 = vector.multi_reduction <add>, %3, %cst [1] : vector<8x32xf32> to vector<8xf32>
    %5 = vector.shape_cast %4 : vector<8xf32> to vector<8x1xf32>
    %6 = arith.mulf %0, %2 : vector<8x32xf32>
    %cst_5 = arith.constant dense<0.000000e+00> : vector<8xf32>
    %7 = vector.multi_reduction <add>, %6, %cst_5 [1] : vector<8x32xf32> to vector<8xf32>
    %8 = vector.shape_cast %7 : vector<8xf32> to vector<8x1xf32>
    %9 = arith.mulf %0, %0 : vector<8x32xf32>
    %cst_6 = arith.constant dense<0.000000e+00> : vector<8xf32>
    %10 = vector.multi_reduction <add>, %9, %cst_6 [1] : vector<8x32xf32> to vector<8xf32>
    %11 = vector.shape_cast %10 : vector<8xf32> to vector<8x1xf32>
    %12 = arith.mulf %1, %1 : vector<8x32xf32>
    %cst_7 = arith.constant dense<0.000000e+00> : vector<8xf32>
    %13 = vector.multi_reduction <add>, %12, %cst_7 [1] : vector<8x32xf32> to vector<8xf32>
    %14 = vector.shape_cast %13 : vector<8xf32> to vector<8x1xf32>
    %15 = arith.mulf %2, %2 : vector<8x32xf32>
    %cst_8 = arith.constant dense<0.000000e+00> : vector<8xf32>
    %16 = vector.multi_reduction <add>, %15, %cst_8 [1] : vector<8x32xf32> to vector<8xf32>
    %17 = vector.shape_cast %16 : vector<8xf32> to vector<8x1xf32>
    %cst_9 = arith.constant 1.000000e-16 : f32
    %18 = vector.broadcast %cst_9 : f32 to vector<8x1xf32>
    %19 = arith.maximumf %11, %18 : vector<8x1xf32>
    %20 = math.rsqrt %19 : vector<8x1xf32>
    %cst_10 = arith.constant 1.000000e-16 : f32
    %21 = vector.broadcast %cst_10 : f32 to vector<8x1xf32>
    %22 = arith.maximumf %14, %21 : vector<8x1xf32>
    %23 = math.rsqrt %22 : vector<8x1xf32>
    %cst_11 = arith.constant 1.000000e-16 : f32
    %24 = vector.broadcast %cst_11 : f32 to vector<8x1xf32>
    %25 = arith.maximumf %17, %24 : vector<8x1xf32>
    %26 = math.rsqrt %25 : vector<8x1xf32>
    %27 = arith.mulf %5, %20 : vector<8x1xf32>
    %28 = arith.mulf %27, %23 : vector<8x1xf32>
    %29 = arith.mulf %8, %20 : vector<8x1xf32>
    %30 = arith.mulf %29, %26 : vector<8x1xf32>
    %31 = arith.subf %30, %28 : vector<8x1xf32>
    %cst_12 = arith.constant 5.000000e-01 : f32
    %32 = vector.broadcast %cst_12 : f32 to vector<8x1xf32>
    %33 = arith.addf %31, %32 : vector<8x1xf32>
    %cst_13 = arith.constant 0.000000e+00 : f32
    %34 = vector.broadcast %cst_13 : f32 to vector<8x1xf32>
    %35 = arith.maximumf %33, %34 : vector<8x1xf32>
    %36 = tpu.iota {dimensions = array<i32: 0>} : vector<8x1xi32>
    %c8_i32 = arith.constant 8 : i32
    %37 = arith.muli %arg0, %c8_i32 : i32
    %38 = vector.broadcast %37 : i32 to vector<8x1xi32>
    %39 = arith.addi %36, %38 : vector<8x1xi32>
    %c8_i32_14 = arith.constant 8 : i32
    %40 = vector.broadcast %c8_i32_14 : i32 to vector<8x1xi32>
    %41 = arith.cmpi slt, %39, %40 : vector<8x1xi32>
    %cst_15 = arith.constant 0.000000e+00 : f32
    %42 = vector.broadcast %cst_15 : f32 to vector<8x1xf32>
    %43 = arith.select %41, %35, %42 : vector<8x1xi1>, vector<8x1xf32>
    %c0_16 = arith.constant 0 : index
    %c0_17 = arith.constant 0 : index
    %44 = vector.load %arg4[%c0_16, %c0_17] : memref<8x1xf32, #tpu.memory_space<vmem>>, vector<8x1xf32>
    tpu.vector_store %arg4[%c0_16, %c0_17], %43 {strides = array<i32>} : memref<8x1xf32, #tpu.memory_space<vmem>>, vector<8x1xf32>,
    return
  }
  func.func @transform_0(%arg0: i32) -> (i32, i32) {
    %c0_i32 = arith.constant 0 : i32
    %c0_i32_0 = arith.constant 0 : i32
    return %arg0, %c0_i32 : i32, i32
  }
  func.func @transform_1(%arg0: i32) -> (i32, i32) {
    %c0_i32 = arith.constant 0 : i32
    %c0_i32_0 = arith.constant 0 : i32
    return %arg0, %c0_i32 : i32, i32
  }
  func.func @transform_2(%arg0: i32) -> (i32, i32) {
    %c0_i32 = arith.constant 0 : i32
    %c0_i32_0 = arith.constant 0 : i32
    return %arg0, %c0_i32 : i32, i32
  }
  func.func @transform_3(%arg0: i32) -> (i32, i32) {
    %c0_i32 = arith.constant 0 : i32
    %c0_i32_0 = arith.constant 0 : i32
    return %arg0, %c0_i32 : i32, i32
  }
}

</mosaic_0001>

<bundles_post_ra>
// kernel: tpu_custom_call.1
= control target key start
LH: loop header
LB: loop body
LE: loop exit
PB: predicated region body
PF: predicated region fallthrough
CT: control target
= control target key end

     0   :  { %8 = vsyncpa [#allocation3], 0  ;;  %s214_s0 = inlined_call_operand.hbm [shape: f32[8,32], index: 0, kind: input, shape index: {}]   ;;  %s215_s1 = inlined_call_operand.hbm [shape: f32[8,32], index: 1, kind: input, shape index: {}]   ;;  %s216_s2 = inlined_call_operand.hbm [shape: f32[8,32], index: 2, kind: input, shape index: {}]   ;;  %s217_s3 = inlined_call_operand.vmem [shape: f32[8,1], index: 3, kind: output, shape index: {}]  }
   0x1   :  { %9 = vsyncpa [#allocation5], 0  ;;  %s174_s12 = smov [#allocation4]   ;;  %s175_s14 = smov [#allocation2]  }
   0x2   :  { %s26_s13 = sshll.u32 %s174_s12, 4  ;;  %s16_s15 = sshll.u32 %s175_s14, 4  ;;  %s27_s13 = int_to_ptr.vmem [resolvable:$true] %s26_s13  ;;  %s17_s15 = int_to_ptr.vmem [resolvable:$true] %s16_s15 }
   0x3   :  { %s118_s16 = scalar_lea.vmem %s27_s13, 128  ;;  %p123_p1 = scmp.lt.s32.totalorder %s27_s13, %s27_s13 }
   0x4   :  { %p119_p0 = scmp.ne.s32.totalorder %s27_s13, %s118_s16  ;;  %p124_p2 = scmp.lt.s32.totalorder %s118_s16, %s118_s16 }
   0x6   :  { %p125_p3 = por %p124_p2, %p123_p1 }
   0x8   :  { %p126_p4 = pnand %p125_p3, %p119_p0 }
   0xa   :  { %129 = shalt.err (!%p126_p4)
}
   0xb   :  { %29 = dma.hbm_to_vmem [thread:$0]  %s215_s1, 128, %s27_s13, [#allocation5]  }
   0xc   :  { %s138_s19 = scalar_lea.vmem %s17_s15, 128  ;;  %p143_p6 = scmp.lt.s32.totalorder %s17_s15, %s17_s15 }
   0xd   :  { %p139_p5 = scmp.ne.s32.totalorder %s17_s15, %s138_s19  ;;  %p144_p7 = scmp.lt.s32.totalorder %s138_s19, %s138_s19 }
   0xf   :  { %p145_p8 = por %p144_p7, %p143_p6 }
  0x11   :  { %p146_p9 = pnand %p145_p8, %p139_p5 }
  0x13   :  { %149 = shalt.err (!%p146_p9)
}
  0x14   :  { %19 = dma.hbm_to_vmem [thread:$0]  %s214_s0, 128, %s17_s15, [#allocation3]  }
  0x15   :  { %s176_s22 = smov [#allocation6]  }
  0x16   :  { %s36_s23 = sshll.u32 %s176_s22, 4  ;;  %s37_s23 = int_to_ptr.vmem [resolvable:$true] %s36_s23 }
  0x17   :  { %s158_s24 = scalar_lea.vmem %s37_s23, 128  ;;  %p163_p11 = scmp.lt.s32.totalorder %s37_s23, %s37_s23 }
  0x18   :  { %p159_p10 = scmp.ne.s32.totalorder %s37_s23, %s158_s24  ;;  %p164_p12 = scmp.lt.s32.totalorder %s158_s24, %s158_s24 }
  0x1a   :  { %p165_p13 = por %p164_p12, %p163_p11 }
  0x1c   :  { %p166_p0 = pnand %p165_p13, %p159_p10 }
  0x1e   :  { %169 = shalt.err (!%p166_p0)
}
  0x1f   :  { %39 = dma.hbm_to_vmem [thread:$0]  %s216_s2, 128, %s37_s23, [#allocation5]  }
  0x20   :  { %170 = dma.done.wait [#allocation3], 128  }
  0x21   :  { %171 = vsyncadd [#allocation3], 4294967168 }
  0x22   :  { %172 = dma.done.wait [#allocation5], 256  }
  0x23   :  { %173 = vsyncadd [#allocation5], 4294967040  ;;  %v49_v0 = vld [vmem:[#allocation2] sm:$0xff]  ;;  %vm53_vm0 = vcmask 261120   ;;  %v51_v1 = vld [vmem:[#allocation6] sm:$0xff]  ;;  %vm93_vm1 = vcmask 7168  }
  0x24   :  { %v50_v2 = vld [vmem:[#allocation4] sm:$0xff]  ;;  %v61_v3 = vmul.f32 %v49_v0, %v49_v0  ;;  %v69_v4 = vmul.f32 %v51_v1, %v51_v1  ;;  %v57_v10 = vmul.f32 %v51_v1, %v49_v0 }
  0x25   :  { %v65_v5 = vmul.f32 %v50_v2, %v50_v2  ;;  %v52_v6 = vmul.f32 %v50_v2, %v49_v0 }
  0x26   :  { %v62_v7 = vsel %vm53_vm0, %v61_v3, 0.0  ;;  %v70_v8 = vsel %vm53_vm0, %v69_v4, 0.0  ;;  %v58_v12 = vsel %vm53_vm0, %v57_v10, 0.0 }
  0x27   :  { %63 = vadd.xlane.f32.xlu0 %v62_v7  ;;  %71 = vadd.xlane.f32.xlu1 %v70_v8  ;;  %v66_v9 = vsel %vm53_vm0, %v65_v5, 0.0  ;;  %v54_v11 = vsel %vm53_vm0, %v52_v6, 0.0 }
  0x2b   :  { %67 = vadd.xlane.f32.xlu0 %v66_v9  ;;  %55 = vadd.xlane.f32.xlu1 %v54_v11 }
  0x2f   :  { %59 = vadd.xlane.f32.xlu0 %v58_v12 }
  0xb0   :  { %v64_v13 = vpop.xlane.xlu0 %63  ;;  %v72_v14 = vpop.xlane.xlu1 %71 }
  0xb1   :  { %v73_v15 = vmax.f32 %v64_v13, 1e-16  ;;  %v77_v16 = vmax.f32 %v72_v14, 1e-16 }
  0xb3   :  { %104 = vrsqrt.f32 %v73_v15 }
  0xb4   :  { %v68_v17 = vpop.xlane.xlu0 %67  ;;  %106 = vrsqrt.f32 %v77_v16  ;;  %v56_v21 = vpop.xlane.xlu1 %55 }
  0xb5   :  { %v75_v18 = vmax.f32 %v68_v17, 1e-16 }
  0xb7   :  { %108 = vrsqrt.f32 %v75_v18 }
  0xb8   :  { %v60_v19 = vpop.xlane.xlu0 %59 }
  0xc0   :  { %v105_v20 = vpop.eup %104 }
  0xc1   :  { %v81_v22 = vmul.f32 %v105_v20, %v60_v19  ;;  %v107_v23 = vpop.eup %106  ;;  %v79_v24 = vmul.f32 %v105_v20, %v56_v21 }
  0xc3   :  { %v82_v26 = vmul.f32 %v107_v23, %v81_v22 }
  0xc4   :  { %v109_v25 = vpop.eup %108 }
  0xc5   :  { %v80_v27 = vmul.f32 %v109_v25, %v79_v24 }
  0xc7   :  { %v83_v28 = vsub.f32 %v82_v26, %v80_v27 }
  0xc9   :  { %v84_v29 = vadd.f32 0.5, %v83_v28 }
  0xcb   :  { %v85_v30 = vmax.f32 %v84_v29, 0.0 }
  0xcd   :  { %94 = vst.msk [vmem:[%s217_s3] sm:$0xff] %vm93_vm1, %v85_v30 }
  0xce   :  { %99 = vsyncpa [#allocation3], 1 }
  0xcf   :  { %100 = vsyncpa [#allocation5], 1 }

</bundles_post_ra>
